<compile_context>
chip_gen: v7x
topology: tpu7x:2x2x1
jax: 0.10.0
libtpu: 0.0.40
codegen_flags: <defaults>
</compile_context>

<pallas_src>
import jax
import jax.numpy as jnp
from jax.experimental import pallas as pl
from jax.experimental.pallas import tpu as pltpu

BOX_THRESHOLD = 0.45
TEXT_THRESHOLD = 0.4
IMAGENET_MEAN = (0.485, 0.456, 0.406)
IMAGENET_STD = (0.229, 0.224, 0.225)

# Scaled-down stand-ins for SAM2's 1024-pixel / 256-dim image embedding.
SAM_IMG_SIZE = 128
PATCH = 16
EMBED_DIM = 32
E_PAD = 128                       # lane-dense output width (zero-padded cols)
PATCH_DIM = 3 * PATCH * PATCH     # 768 = 6 * 128 (lane-dense contraction dim)


# --------------------------------------------------------------------------- #
# Pallas kernel: fused patch-embed matmul + bias + per-token mask epilogue.
# ImageNet normalization and the uint8 /255 de-quantization are folded into the
# effective weight/bias ahead of time (exact), so the kernel is one MXU matmul
# (bf16 operands, f32 accumulation) with a cheap VPU epilogue writing a
# lane-dense (tm, 128) block.
# --------------------------------------------------------------------------- #
def _fused_patch_embed_kernel(p_ref, w_ref, b_ref, m_ref, o_ref):
    acc = jnp.dot(p_ref[...], w_ref[...], preferred_element_type=jnp.float32)
    o_ref[...] = (acc + b_ref[...]) * m_ref[...]


def fused_patch_embed(patches, w_eff, b_eff, mask_rows, *, tm=64):
    """patches: (M, K) bf16, w_eff: (K, E_PAD) bf16, b_eff: (1, E_PAD) f32,
    mask_rows: (M, 1) f32  ->  (M, E_PAD) f32 == (patches @ w + b) * mask."""
    M, K = patches.shape
    tm = min(tm, M)
    assert M % tm == 0 and K % 128 == 0 and w_eff.shape == (K, E_PAD)
    return pl.pallas_call(
        _fused_patch_embed_kernel,
        out_shape=jax.ShapeDtypeStruct((M, E_PAD), jnp.float32),
        grid=(M // tm,),
        in_specs=[
            pl.BlockSpec((tm, K), lambda i: (i, 0)),
            pl.BlockSpec((K, E_PAD), lambda i: (0, 0)),
            pl.BlockSpec((1, E_PAD), lambda i: (0, 0)),
            pl.BlockSpec((tm, 1), lambda i: (i, 0)),
        ],
        out_specs=pl.BlockSpec((tm, E_PAD), lambda i: (i, 0)),
        compiler_params=pltpu.CompilerParams(
            dimension_semantics=("parallel",),  # >=2 grid steps -> both v7x TCs
        ),
    )(patches, w_eff, b_eff, mask_rows)


# --------------------------------------------------------------------------- #
# Glue (plain JAX) reproducing the forward-pass plumbing
# --------------------------------------------------------------------------- #
def preprocess_pooled_for_gdino(batch):
    """Exactly mean_{H,W}(F.normalize(F.resize(batch))) — the per-channel affine
    commutes with the spatial mean, so the normalized 800x800 tensor is never
    materialized (removes the largest HBM traffic of the pipeline)."""
    B, C, H, W = batch.shape
    size, max_size = 800, 1333
    scale = size / min(H, W)
    new_h, new_w = int(round(H * scale)), int(round(W * scale))
    if max(new_h, new_w) > max_size:
        scale = max_size / max(new_h, new_w)
        new_h, new_w = int(round(new_h * scale)), int(round(new_w * scale))
    # TODO(synk): torchvision antialiased resize is not bit-exactly reproducible;
    # plain bilinear resize is used here.
    imgs = jax.image.resize(batch, (B, C, new_h, new_w), method="linear")
    pooled = jnp.mean(imgs, axis=(2, 3))                                # (B, 3)
    mean = jnp.asarray(IMAGENET_MEAN, jnp.float32)
    std = jnp.asarray(IMAGENET_STD, jnp.float32)
    return (pooled - mean) / std


def preprocess_batch_for_sam2(batch):
    out = (jnp.clip(batch, 0.0, 1.0) * 255.0).astype(jnp.uint8)
    return jnp.transpose(out, (0, 2, 3, 1))  # NHWC uint8, one "image" per row


def _box_to_masks(box_cxcywh, has_box, H, W, He, We):
    """Rasterize a cxcywh box (normalized) into a (H, W) mask and its
    nearest-neighbour downsample to the token grid (He, We)."""
    scale = jnp.asarray([W, H, W, H], jnp.float32)
    b = box_cxcywh * scale
    cx, cy, bw, bh = b[0], b[1], b[2], b[3]
    x0, x1 = cx - bw / 2.0, cx + bw / 2.0
    y0, y1 = cy - bh / 2.0, cy + bh / 2.0
    ys = jnp.arange(H, dtype=jnp.float32)[:, None] + 0.5
    xs = jnp.arange(W, dtype=jnp.float32)[None, :] + 0.5
    mask_full = ((xs >= x0) & (xs <= x1) & (ys >= y0) & (ys <= y1)).astype(
        jnp.float32
    )
    # F.interpolate(mode='nearest') index rule: src = floor(dst * in/out)
    yi = jnp.floor(jnp.arange(He) * (H / He)).astype(jnp.int32)
    xi = jnp.floor(jnp.arange(We) * (W / We)).astype(jnp.int32)
    mask_tok = mask_full[yi][:, xi]
    # "boxes.numel() == 0" branch of the original: pass features through unmasked
    mask_tok = jnp.where(has_box, mask_tok, jnp.ones_like(mask_tok))
    return mask_full, mask_tok


class GSAM:
    """Synthetic Pallas/JAX re-implementation of the GSAM forward pass."""

    def __init__(self):
        key = jax.random.PRNGKey(42)
        k1, k2, k3 = jax.random.split(key, 3)
        # Synthetic "SAM2 image encoder" = single patch-embed projection.
        # TODO(synk): full SAM2 Hiera encoder is not translatable; stand-in only.
        w_patch = 0.02 * jax.random.normal(k1, (PATCH_DIM, EMBED_DIM), jnp.float32)
        b_patch = jnp.zeros((1, EMBED_DIM), jnp.float32)

        # Fold (x/255 - mean_c) / std_c into the linear projection (exact):
        #   ((p/255 - m) * istd) @ W + b == p @ (W * istd / 255) + (b - (m*istd) @ W)
        mean_vec = jnp.repeat(jnp.asarray(IMAGENET_MEAN, jnp.float32), PATCH * PATCH)
        istd_vec = jnp.repeat(1.0 / jnp.asarray(IMAGENET_STD, jnp.float32), PATCH * PATCH)
        w_eff = w_patch * (istd_vec / 255.0)[:, None]                   # (768, 32)
        b_eff = b_patch - ((mean_vec * istd_vec) @ w_patch)[None, :]    # (1, 32)
        # Zero-pad E to 128 lanes so the kernel's output store is full-lane.
        self.w_eff = jnp.pad(w_eff, ((0, 0), (0, E_PAD - EMBED_DIM))).astype(jnp.bfloat16)
        self.b_eff = jnp.pad(b_eff, ((0, 0), (0, E_PAD - EMBED_DIM))).astype(jnp.float32)

        # Synthetic "GroundingDINO" box head (pooled-linear).
        # TODO(synk): GroundingDINO Swin-T + BERT grounding has no Pallas
        # equivalent; replaced with a deterministic box/confidence head.
        self.w_box = jax.random.normal(k2, (3, 4), jnp.float32)
        self.b_box = jnp.asarray([0.0, 0.0, -0.3, -0.3], jnp.float32)
        self.w_conf = jax.random.normal(k3, (3, 1), jnp.float32)
        self.b_conf = jnp.asarray([0.2], jnp.float32)

        self._forward_jit = jax.jit(self._forward_device)

    def _sam2_masked_embedding(self, sam2_imgs_uint8, masks_tok):
        # Mirrors SAM2ImagePredictor.set_image + (token_embed * mask):
        # uint8 HWC -> float -> resize -> [normalize folded into weights] ->
        # patch-embed matmul with per-token mask epilogue -> (B, E, He, We).
        x = sam2_imgs_uint8.astype(jnp.float32)        # 0..255 (/255 folded in w_eff)
        x = jnp.transpose(x, (0, 3, 1, 2))             # NCHW
        B = x.shape[0]
        x = jax.image.resize(x, (B, 3, SAM_IMG_SIZE, SAM_IMG_SIZE), method="linear")
        gh = gw = SAM_IMG_SIZE // PATCH
        p = x.reshape(B, 3, gh, PATCH, gw, PATCH)
        p = jnp.transpose(p, (0, 2, 4, 1, 3, 5)).reshape(B * gh * gw, PATCH_DIM)
        p = p.astype(jnp.bfloat16)                     # bf16 MXU operands
        m_rows = masks_tok.reshape(B * gh * gw, 1).astype(jnp.float32)
        out = fused_patch_embed(p, self.w_eff, self.b_eff, m_rows)  # (M, 128) f32
        emb = out[:, :EMBED_DIM].reshape(B, gh, gw, EMBED_DIM)
        return jnp.transpose(emb, (0, 3, 1, 2))        # (B, EMBED_DIM, gh, gw)

    def _forward_device(self, image):
        # --- synthetic GroundingDINO predict: best box + confidence per image
        pooled = preprocess_pooled_for_gdino(image)              # (B, 3)
        sam2_imgs = preprocess_batch_for_sam2(image)             # (B, H, W, 3) uint8
        boxes = jax.nn.sigmoid(pooled @ self.w_box + self.b_box)       # cxcywh, norm.
        conf = jax.nn.sigmoid(pooled @ self.w_conf + self.b_conf)[:, 0]
        has_box = conf > BOX_THRESHOLD

        # --- synthetic box->mask prediction (full-res + token-grid masks)
        H, W = sam2_imgs.shape[1], sam2_imgs.shape[2]
        He = We = SAM_IMG_SIZE // PATCH
        # TODO(synk): SAM2 mask decoder replaced by rasterizing the box itself.
        masks_full, masks_tok = jax.vmap(
            lambda bx, hb: _box_to_masks(bx, hb, H, W, He, We)
        )(boxes, has_box)

        # --- feat = token_embed * mask (fused into the Pallas matmul epilogue)
        feat_batch = self._sam2_masked_embedding(sam2_imgs, masks_tok)
        return feat_batch, masks_full, has_box

    def __call__(self, image, prompt, return_mask=True):
        del prompt  # TODO(synk): text conditioning branch not translatable
        feat_batch, masks_full, has_box = self._forward_jit(image)
        if not return_mask:
            return feat_batch, None  # no host sync at all on this path
        # Single deferred host sync, after all device work has been dispatched.
        has_box_host = jax.device_get(has_box)
        masks_out = [
            (masks_full[i] if bool(has_box_host[i]) else None)
            for i in range(image.shape[0])
        ]
        return feat_batch, masks_out


if __name__ == "__main__":
    key = jax.random.PRNGKey(0)
    image = jax.random.uniform(key, (2, 3, 16, 16), dtype=jnp.float32)  # NCHW in [0,1]
    model = GSAM()
    feat_batch, masks_out = model(image, "object.", return_mask=True)
    jax.block_until_ready(feat_batch)
    assert feat_batch.shape == (
        2,
        EMBED_DIM,
        SAM_IMG_SIZE // PATCH,
        SAM_IMG_SIZE // PATCH,
    )
    assert len(masks_out) == 2
    print("KERNEL_OK")
</pallas_src>

<mosaic_0001>
module attributes {stable_mosaic.version = 11 : i64} {
  func.func @_fused_patch_embed_kernel(%arg0: i32, %arg1: memref<64x768xbf16, #tpu.memory_space<vmem>>, %arg2: memref<768x128xbf16, #tpu.memory_space<vmem>>, %arg3: memref<1x128xf32, #tpu.memory_space<vmem>>, %arg4: memref<64x1xf32, #tpu.memory_space<vmem>>, %arg5: memref<64x128xf32, #tpu.memory_space<vmem>>) attributes {dimension_semantics = [#tpu.dimension_semantics<parallel>], iteration_bounds = array<i64: 2>, scalar_prefetch = 0 : i64, scratch_operands = 0 : i64, tpu.core_type = #tpu.core_type<tc>, window_params = [{transform_indices = @transform_0, window_bounds = array<i64: 64, 768>}, {pipeline_mode = #tpu.pipeline_mode<synchronous>, transform_indices = @transform_1, window_bounds = array<i64: 768, 128>}, {pipeline_mode = #tpu.pipeline_mode<synchronous>, transform_indices = @transform_2, window_bounds = array<i64: 1, 128>}, {transform_indices = @transform_3, window_bounds = array<i64: 64, 1>}, {transform_indices = @transform_4, window_bounds = array<i64: 64, 128>}]} {
    %c0 = arith.constant 0 : index
    %c0_0 = arith.constant 0 : index
    %0 = vector.load %arg1[%c0, %c0_0] : memref<64x768xbf16, #tpu.memory_space<vmem>>, vector<64x768xbf16>
    %c0_1 = arith.constant 0 : index
    %c0_2 = arith.constant 0 : index
    %1 = vector.load %arg2[%c0_1, %c0_2] : memref<768x128xbf16, #tpu.memory_space<vmem>>, vector<768x128xbf16>
    %cst = arith.constant dense<0.000000e+00> : vector<64x128xf32>
    %2 = tpu.matmul %0, %1, %cst {dimension_numbers = #tpu.dot_dimension_numbers<[1], [0], [0], [1], [0, 0, 1, 1], [], []>} : vector<64x768xbf16>, vector<768x128xbf16>, vector<64x128xf32> -> vector<64x128xf32>
    %c0_3 = arith.constant 0 : index
    %c0_4 = arith.constant 0 : index
    %3 = vector.load %arg3[%c0_3, %c0_4] : memref<1x128xf32, #tpu.memory_space<vmem>>, vector<1x128xf32>
    %4 = vector.broadcast %3 : vector<1x128xf32> to vector<64x128xf32>
    %5 = arith.addf %2, %4 : vector<64x128xf32>
    %c0_5 = arith.constant 0 : index
    %c0_6 = arith.constant 0 : index
    %6 = vector.load %arg4[%c0_5, %c0_6] : memref<64x1xf32, #tpu.memory_space<vmem>>, vector<64x1xf32>
    %7 = vector.broadcast %6 : vector<64x1xf32> to vector<64x128xf32>
    %8 = arith.mulf %5, %7 : vector<64x128xf32>
    %c0_7 = arith.constant 0 : index
    %c0_8 = arith.constant 0 : index
    %9 = vector.load %arg5[%c0_7, %c0_8] : memref<64x128xf32, #tpu.memory_space<vmem>>, vector<64x128xf32>
    tpu.vector_store %arg5[%c0_7, %c0_8], %8 {strides = array<i32>} : memref<64x128xf32, #tpu.memory_space<vmem>>, vector<64x128xf32>,
    return
  }
  func.func @transform_0(%arg0: i32) -> (i32, i32) {
    %c0_i32 = arith.constant 0 : i32
    %c0_i32_0 = arith.constant 0 : i32
    return %arg0, %c0_i32 : i32, i32
  }
  func.func @transform_1(%arg0: i32) -> (i32, i32) {
    %c0_i32 = arith.constant 0 : i32
    %c0_i32_0 = arith.constant 0 : i32
    %c0_i32_1 = arith.constant 0 : i32
    return %c0_i32, %c0_i32_0 : i32, i32
  }
  func.func @transform_2(%arg0: i32) -> (i32, i32) {
    %c0_i32 = arith.constant 0 : i32
    %c0_i32_0 = arith.constant 0 : i32
    %c0_i32_1 = arith.constant 0 : i32
    return %c0_i32, %c0_i32_0 : i32, i32
  }
  func.func @transform_3(%arg0: i32) -> (i32, i32) {
    %c0_i32 = arith.constant 0 : i32
    %c0_i32_0 = arith.constant 0 : i32
    return %arg0, %c0_i32 : i32, i32
  }
  func.func @transform_4(%arg0: i32) -> (i32, i32) {
    %c0_i32 = arith.constant 0 : i32
    %c0_i32_0 = arith.constant 0 : i32
    return %arg0, %c0_i32 : i32, i32
  }
}

</mosaic_0001>

<bundles_post_ra>
// kernel: _forward_device.1
= control target key start
LH: loop header
LB: loop body
LE: loop exit
PB: predicated region body
PF: predicated region fallthrough
CT: control target
= control target key end

     0   :  { %9 = vsyncpa [#allocation3], 0  ;;  %s1885_s0 = inlined_call_operand.vmem [shape: bf16[128,768], index: 0, kind: input, shape index: {}]   ;;  %s1886_s1 = inlined_call_operand.vmem [shape: bf16[768,128], index: 1, kind: input, shape index: {}]   ;;  %s1887_s2 = inlined_call_operand.vmem [shape: f32[1,128], index: 2, kind: input, shape index: {}]   ;;  %s1888_s3 = inlined_call_operand.vmem [shape: f32[128,1], index: 3, kind: input, shape index: {}]   ;;  %s1889_s4 = inlined_call_operand.hbm [shape: f32[128,128], index: 4, kind: output, shape index: {}]  }
   0x1   :  { %11 = vsyncpa [#allocation3 + $0x1], 0  ;;  %s1553_s15 = smov 0   ;;  %s1555_s16 = smov 0  }
   0x2   :  { %s1557_s17 = smov 0   ;;  %s1559_s18 = smov 0  }
   0x3 LB: > { %s1574_s19 = sadd.s32 4294967295, %s1522_s18   ;;  %s1107_s20 = sadd.s32 4294967294, %s1522_s18   ;;  %s1522_s18 = sphi %s1559_s18, %s1895_s18   ;;  %s1518_s17 = sphi %s1557_s17, %s1894_s17   ;;  %s1514_s16 = sphi %s1555_s16, %s1893_s16   ;;  %s1510_s15 = sphi %s1553_s15, %s1892_s15  }
   0x4   : > { %s1578_s21 = sadd.s32 1, %s1522_s18   ;;  %s118_s22 = sadd.s32 1, %s1518_s17 }
   0x5   : > { %s115_s23 = ssub.s32 %s1522_s18, %s1578_s21  ;;  %p128_p0 = scmp.ne.s32.totalorder %s1518_s17, %s1514_s16 }
   0x6   : > { %p116_p1 = scmp.eq.s32.totalorder %s115_s23, 0  ;;  %p129_p2 = scmp.eq.s32.totalorder %s1574_s19, 1 }
   0x7   : > { %p134_p3 = scmp.ne.s32.totalorder %s1514_s16, %s1510_s15  ;;  %p135_p4 = scmp.eq.s32.totalorder %s1107_s20, 1 }
   0x8   : > { %s1589_s24 = scalar_select %p116_p1, %s1518_s17, %s118_s22  }
   0x9   : > { %p1591_p5 = por %p129_p2, %p128_p0  ;;  %p1595_p6 = por %p135_p4, %p134_p3 }
   0xa   : > { %p1110_p7 = scmp.ge.s32.totalorder %s1522_s18, 1  ;;  %p178_p8 = scmp.lt.s32.totalorder %s1522_s18, 3 }
   0xc   : > { %p179_p9 = pnand %p1110_p7, %p178_p8 }
   0xd   : > { %v1376_v0 = vld [vmem:[%s1886_s1 + $0x40] sm:$0xff] (!%p179_p9)   ;;  %v1524_v4 = vmov (!%p179_p9), 0   ;;  %v1380_v5 = vld [vmem:[%s1886_s1 + $0x48] sm:$0xff] (!%p179_p9)   ;;  %v1384_v9 = vld [vmem:[%s1886_s1 + $0x50] sm:$0xff] (!%p179_p9)   ;;  %s1112_s14 = sshll.u32 (!%p179_p9), %s1574_s19, 3  ;;  %s1194_s13 = sshll.u32 (!%p179_p9), %s1574_s19, 10 }
   0xe   : > { %182 = sbr.rel (%p179_p9) target bundleno = 324 (0x144), region = 36  ;;  %v1377_v1 = vld [vmem:[%s1886_s1 + $0xc0] sm:$0xff] (!%p179_p9)   ;;  %1195 = vmatprep.subr.bf16.mxu0 (!%p179_p9), %v1376_v0  ;;  %1375 = vset.pattern.permute.xlu1 (!%p179_p9), %v1524_v4  ;;  %v1381_v6 = vld [vmem:[%s1886_s1 + $0xc8] sm:$0xff] (!%p179_p9)   ;;  %v1385_v10 = vld [vmem:[%s1886_s1 + $0xd0] sm:$0xff] (!%p179_p9)   ;;  %p211_p10 = scmp.lt.s32.totalorder (!%p179_p9), %s1112_s14, 15 }
   0xf   : > { %v1378_v2 = vld [vmem:[%s1886_s1] sm:$0xff] (!%p179_p9)   ;;  %1235 = vmatprep.subr.bf16.mxu1 (!%p179_p9), %v1377_v1  ;;  %1374 = vset.pattern.permute.xlu0 (!%p179_p9), %v1524_v4  ;;  %v1382_v7 = vld [vmem:[%s1886_s1 + $0x8] sm:$0xff] (!%p179_p9)   ;;  %v1386_v11 = vld [vmem:[%s1886_s1 + $0x10] sm:$0xff] (!%p179_p9)  }
  0x10   : > { %v1379_v3 = vld [vmem:[%s1886_s1 + $0x80] sm:$0xff] (!%p179_p9)   ;;  %1196 = vmatpush3.bf16.msra.mxu0 (!%p179_p9), %v1378_v2  ;;  %v1383_v8 = vld [vmem:[%s1886_s1 + $0x88] sm:$0xff] (!%p179_p9)   ;;  %v1387_v12 = vld [vmem:[%s1886_s1 + $0x90] sm:$0xff] (!%p179_p9)  }
  0x11   : > { %1236 = vmatpush3.bf16.msra.mxu1 (!%p179_p9), %v1379_v3  ;;  %1197 = vmatprep.subr.bf16.mxu0 (!%p179_p9), %v1380_v5  ;;  %v1388_v13 = vld [vmem:[%s1886_s1 + $0x58] sm:$0xff] (!%p179_p9)   ;;  %v1392_v17 = vld [vmem:[%s1886_s1 + $0x60] sm:$0xff] (!%p179_p9)   ;;  %v1396_v21 = vld [vmem:[%s1886_s1 + $0x68] sm:$0xff] (!%p179_p9)  }
  0x12   : > { %1237 = vmatprep.subr.bf16.mxu1 (!%p179_p9), %v1381_v6  ;;  %v1389_v14 = vld [vmem:[%s1886_s1 + $0xd8] sm:$0xff] (!%p179_p9)   ;;  %v1393_v18 = vld [vmem:[%s1886_s1 + $0xe0] sm:$0xff] (!%p179_p9)   ;;  %v1397_v22 = vld [vmem:[%s1886_s1 + $0xe8] sm:$0xff] (!%p179_p9)  }
  0x13   : > { %v1390_v15 = vld [vmem:[%s1886_s1 + $0x18] sm:$0xff] (!%p179_p9)   ;;  %v1394_v19 = vld [vmem:[%s1886_s1 + $0x20] sm:$0xff] (!%p179_p9)   ;;  %v1398_v23 = vld [vmem:[%s1886_s1 + $0x28] sm:$0xff] (!%p179_p9)  }
  0x14   : > { %1198 = vmatpush3.bf16.msra.mxu0 (!%p179_p9), %v1382_v7  ;;  %v1391_v16 = vld [vmem:[%s1886_s1 + $0x98] sm:$0xff] (!%p179_p9)   ;;  %v1395_v20 = vld [vmem:[%s1886_s1 + $0xa0] sm:$0xff] (!%p179_p9)   ;;  %v1399_v24 = vld [vmem:[%s1886_s1 + $0xa8] sm:$0xff] (!%p179_p9)  }
  0x15   : > { %1238 = vmatpush3.bf16.msra.mxu1 %v1383_v8  ;;  %1199 = vmatprep.subr.bf16.mxu0 %v1384_v9  ;;  %s1897_s14 = smov (!%p211_p10, %s1112_s14), 15  ;;  %v1400_v25 = vld [vmem:[%s1886_s1 + $0x70] sm:$0xff]   ;;  %v1404_v29 = vld [vmem:[%s1886_s1 + $0x78] sm:$0xff]   ;;  %v1414_v37 = vld [vmem:[%s1886_s1 + $0x140] sm:$0xff]  }
  0x16   : > { %1239 = vmatprep.subr.bf16.mxu1 %v1385_v10  ;;  %v1401_v26 = vld [vmem:[%s1886_s1 + $0xf0] sm:$0xff]   ;;  %s1331_s30 = smul.u32 24, %s1897_s14  ;;  %v1405_v30 = vld [vmem:[%s1886_s1 + $0xf8] sm:$0xff]   ;;  %v1415_v38 = vld [vmem:[%s1886_s1 + $0x100] sm:$0xff]   ;;  %s1115_s28 = sshll.u32 %s1897_s14, 3 }
  0x17   : > { %v1402_v27 = vld [vmem:[%s1886_s1 + $0x30] sm:$0xff]   ;;  %v1406_v31 = vld [vmem:[%s1886_s1 + $0x38] sm:$0xff]   ;;  %v1416_v39 = vld [vmem:[%s1886_s1 + $0x148] sm:$0xff]   ;;  %s1773_s7 = scalar_lea.vmem %s1888_s3, %s1115_s28  ;;  %s1835_s28 = scalar_lea.hbm %s1889_s4, %s1194_s13 }
  0x18   : > { %1200 = vmatpush3.bf16.msra.mxu0 %v1386_v11  ;;  %v1403_v28 = vld [vmem:[%s1886_s1 + $0xb0] sm:$0xff]   ;;  %s1698_s22 = scalar_lea.vmem %s1885_s0, %s1331_s30  ;;  %v1407_v32 = vld [vmem:[%s1886_s1 + $0xb8] sm:$0xff]   ;;  %v1417_v40 = vld [vmem:[%s1886_s1 + $0x108] sm:$0xff]   ;;  %s1525_s30 = smov [#allocation2]  }
  0x19   : > { %1240 = vmatpush3.bf16.msra.mxu1 %v1387_v12  ;;  %1201 = vmatprep.subr.bf16.mxu0 %v1388_v13  ;;  %v1408_v33 = vld [vmem:[%s1698_s22] ss:$24 sps:$4 sm:$0xff]   ;;  %v1410_v34 = vld [vmem:[%s1698_s22 + $0x4] ss:$24 sps:$4 sm:$0xff]   ;;  %v1418_v41 = vld [vmem:[%s1698_s22 + $0x34] ss:$24 sps:$4 sm:$0xff]  }
  0x1a   : > { %1241 = vmatprep.subr.bf16.mxu1 %v1389_v14  ;;  %v1411_v35 = vld [vmem:[%s1698_s22 + $0x8] ss:$24 sps:$4 sm:$0xff]   ;;  %v1413_v36 = vld [vmem:[%s1698_s22 + $0xc] ss:$24 sps:$4 sm:$0xff]   ;;  %792 = vmatprep.mubr.bf16.mxu0 %v1410_v34  ;;  %v1420_v42 = vld [vmem:[%s1698_s22 + $0x3c] ss:$24 sps:$4 sm:$0xff]  }
  0x1b   : > { %857 = vmatprep.mubr.bf16.mxu1 %v1413_v36  ;;  %v1422_v43 = vld [vmem:[%s1698_s22 + $0x30] ss:$24 sps:$4 sm:$0xff]   ;;  %v1426_v47 = vld [vmem:[%s1886_s1 + $0x158] sm:$0xff]   ;;  %v1430_v50 = vld [vmem:[%s1698_s22 + $0x6c] ss:$24 sps:$4 sm:$0xff]   ;;  %s1464_s5 = sshll.u32 %s1525_s30, 4  ;;  %s1465_s5 = int_to_ptr.vmem [resolvable:$false] %s1464_s5 }
  0x1c   : > { %1202 = vmatpush3.bf16.msra.mxu0 %v1390_v15  ;;  %v1423_v44 = vld [vmem:[%s1698_s22 + $0x38] ss:$24 sps:$4 sm:$0xff]   ;;  %v1428_v49 = vld [vmem:[%s1698_s22 + $0x64] ss:$24 sps:$4 sm:$0xff]   ;;  %v1433_v53 = vld [vmem:[%s1698_s22 + $0x68] ss:$24 sps:$4 sm:$0xff]  }
  0x1d   : > { %1242 = vmatpush3.bf16.msra.mxu1 %v1391_v16  ;;  %1203 = vmatprep.subr.bf16.mxu0 %v1392_v17  ;;  %v1424_v45 = vld [vmem:[%s1886_s1 + $0x150] sm:$0xff]   ;;  %v1427_v48 = vld [vmem:[%s1886_s1 + $0x118] sm:$0xff]   ;;  %v1434_v52 = vld [vmem:[%s1886_s1 + $0x160] sm:$0xff]   ;;  %s1466_s6 = scalar_lea.vmem %s1465_s5, 2048 }
  0x1e   : > { %1243 = vmatprep.subr.bf16.mxu1 %v1393_v18  ;;  %v1425_v46 = vld [vmem:[%s1886_s1 + $0x110] sm:$0xff]   ;;  %v1432_v51 = vld [vmem:[%s1698_s22 + $0x60] ss:$24 sps:$4 sm:$0xff]   ;;  %v1436_v55 = vld [vmem:[%s1886_s1 + $0x168] sm:$0xff]  }
  0x1f   : > { %v1435_v54 = vld [vmem:[%s1886_s1 + $0x120] sm:$0xff]   ;;  %v1438_v56 = vld [vmem:[%s1698_s22 + $0x94] ss:$24 sps:$4 sm:$0xff]   ;;  %v1442_v60 = vld [vmem:[%s1698_s22 + $0x90] ss:$24 sps:$4 sm:$0xff]  }
  0x20   : > { %1204 = vmatpush3.bf16.msra.mxu0 %v1394_v19  ;;  %v1440_v57 = vld [vmem:[%s1698_s22 + $0x9c] ss:$24 sps:$4 sm:$0xff]   ;;  %v1437_v58 = vld [vmem:[%s1886_s1 + $0x128] sm:$0xff]   ;;  %v1443_v61 = vld [vmem:[%s1698_s22 + $0x98] ss:$24 sps:$4 sm:$0xff]  }
  0x21   : > { %1244 = vmatpush3.bf16.msra.mxu1 %v1395_v20  ;;  %1205 = vmatprep.subr.bf16.mxu0 %v1396_v21  ;;  %v1444_v59 = vld [vmem:[%s1886_s1 + $0x170] sm:$0xff]   ;;  %v1446_v63 = vld [vmem:[%s1886_s1 + $0x178] sm:$0xff]   ;;  %v955_v4 = vld [vmem:[%s1773_s7] sm:$0xff] }
  0x22   : > { %1245 = vmatprep.subr.bf16.mxu1 %v1397_v22  ;;  %v1445_v62 = vld [vmem:[%s1886_s1 + $0x130] sm:$0xff]   ;;  %v1447_v2 = vld [vmem:[%s1886_s1 + $0x138] sm:$0xff]   ;;  %965 = vperm.xlu0 %1374, %v955_v4   ;;  %v956_v10 = vld [vmem:[%s1773_s7 + $0x8] sm:$0xff] }
  0x23   : > { %v1450_v0 = vld [vmem:[%s1698_s22 + $0x14] ss:$24 sps:$4 sm:$0xff]   ;;  %v1448_v5 = vld [vmem:[%s1698_s22 + $0x10] ss:$24 sps:$4 sm:$0xff]   ;;  %v1454_v7 = vld [vmem:[%s1698_s22 + $0x44] ss:$24 sps:$4 sm:$0xff]  }
  0x24   : > { %1206 = vmatpush3.bf16.msra.mxu0 %v1398_v23  ;;  %v1453_v1 = vld [vmem:[%s1698_s22 + $0x74] ss:$24 sps:$4 sm:$0xff]   ;;  %v1451_v6 = vld [vmem:[%s1698_s22 + $0x70] ss:$24 sps:$4 sm:$0xff]   ;;  %v958_v8 = vld [vmem:[%s1773_s7 + $0x18] sm:$0xff] }
  0x25   : > { %1246 = vmatpush3.bf16.msra.mxu1 %v1399_v24  ;;  %1207 = vmatprep.subr.bf16.mxu0 %v1400_v25  ;;  %v957_v3 = vld [vmem:[%s1773_s7 + $0x10] sm:$0xff]  ;;  %v1456_v9 = vld [vmem:[%s1698_s22 + $0xa4] ss:$24 sps:$4 sm:$0xff]   ;;  %v960_v11 = vld [vmem:[%s1773_s7 + $0x28] sm:$0xff] }
  0x26   : > { %1247 = vmatprep.subr.bf16.mxu1 %v1401_v26  ;;  %975 = vperm.xlu1 %1375, %v957_v3   ;;  %v959_v12 = vld [vmem:[%s1773_s7 + $0x20] sm:$0xff]  ;;  %v962_v15 = vld [vmem:[%s1773_s7 + $0x38] sm:$0xff]  ;;  %v961_v16 = vld [vmem:[%s1773_s7 + $0x30] sm:$0xff] }
  0x27   : > { %970 = vperm.xlu0 %1374, %v956_v10   ;;  %v1458_v13 = vld [vmem:[%s1698_s22 + $0x40] ss:$24 sps:$4 sm:$0xff]  }
  0x28   : > { %1208 = vmatpush3.bf16.msra.mxu0 %v1402_v27  ;;  %v1459_v14 = vld [vmem:[%s1698_s22 + $0xa0] ss:$24 sps:$4 sm:$0xff]   ;;  %s207_s22 = sand.u32 1, %s1514_s16  }
  0x29   : > { %1248 = vmatpush3.bf16.msra.mxu1 %v1403_v28  ;;  %1209 = vmatprep.subr.bf16.mxu0 %v1404_v29  ;;  %v1795_v19 = vld [vmem:[%s1887_s2] ss:$0 sm:$0xff]  ;;  %s1111_s11 = sshll.u32 %s207_s22, 6  ;;  %s1844_s19 = scalar_lea.sflag [#allocation3], %s207_s22 }
  0x2a   : > { %1249 = vmatprep.subr.bf16.mxu1 %v1405_v30  ;;  %980 = vperm.xlu1 %1375, %v958_v8   ;;  %s1820_s12 = scalar_lea.vmem [#allocation2], %s1111_s11 }
  0x2b   : > { %985 = vperm.xlu0 %1374, %v959_v12   ;;  %s1033_s20 = sshll.u32 %s1820_s12, 4  ;;  %s1837_s20 = int_to_ptr.vmem [resolvable:$true] %s1033_s20 }
  0x2c   : > { %1210 = vmatpush3.bf16.msra.mxu0 %v1406_v31  ;;  %s1460_s29 = scalar_lea.vmem %s1837_s20, 1024  ;;  %p1467_p0 = scmp.lt.s32.totalorder %s1837_s20, %s1465_s5 }
  0x2d   : > { %1250 = vmatpush3.bf16.msra.mxu1 %v1407_v32  ;;  %1275 = vmatprep.subr.bf16.mxu0 %v1414_v37  ;;  %p1461_p11 = scmp.ne.s32.totalorder %s1837_s20, %s1460_s29  ;;  %p1468_p1 = scmp.lt.s32.totalorder %s1466_s6, %s1460_s29 }
  0x2e   : > { %1315 = vmatprep.subr.bf16.mxu1 %v1414_v37  ;;  %990 = vperm.xlu1 %1375, %v960_v11  }
  0x2f   : > { %793 = vmatmul.mubr.bf16.vlgmr.msra.gmra.mrb[0].mxu0 %v1408_v33  ;;  %995 = vperm.xlu0 %1374, %v961_v16   ;;  %p1462_p12 = pnand %p1461_p11, %p1591_p5  ;;  %p1469_p2 = por %p1468_p1, %p1467_p0 }
  0x30   : > { %858 = vmatmul.mubr.bf16.vlgmr.msra.gmra.mrb[0].mxu1 %v1411_v35  ;;  %1276 = vmatpush3.bf16.msra.mxu0 %v1415_v38 }
  0x31   : > { %1323 = vmatpush3.bf16.msra.mxu1 %v1415_v38  ;;  %1277 = vmatprep.subr.bf16.mxu0 %v1416_v39  ;;  %p1463_p13 = pneg %p1462_p12 }
  0x32   : > { %1316 = vmatprep.subr.bf16.mxu1 %v1416_v39  ;;  %800 = vmatprep.mubr.bf16.mxu0 %v1418_v41 }
  0x33   : > { %865 = vmatprep.mubr.bf16.mxu1 %v1420_v42  ;;  %1000 = vperm.xlu1 %1375, %v962_v15   ;;  %p1470_p3 = pnand %p1469_p2, %p1463_p13 }
  0x34   : > { %1278 = vmatpush3.bf16.msra.mxu0 %v1417_v40 }
  0x35   : > { %1324 = vmatpush3.bf16.msra.mxu1 %v1417_v40  ;;  %1279 = vmatprep.subr.bf16.mxu0 %v1424_v45 }
  0x36   : > { %1317 = vmatprep.subr.bf16.mxu1 %v1424_v45 }
  0x37   : > { %801 = vmatmul.mubr.bf16.gmra.mrb[4].mxu0 %v1422_v43 }
  0x38   : > { %866 = vmatmul.mubr.bf16.gmra.mrb[4].mxu1 %v1423_v44  ;;  %1280 = vmatpush3.bf16.msra.mxu0 %v1425_v46 }
  0x39   : > { %1325 = vmatpush3.bf16.msra.mxu1 %v1425_v46  ;;  %1281 = vmatprep.subr.bf16.mxu0 %v1426_v47 }
  0x3a   : > { %1318 = vmatprep.subr.bf16.mxu1 %v1426_v47  ;;  %808 = vmatprep.mubr.bf16.mxu0 %v1428_v49 }
  0x3b   : > { %873 = vmatprep.mubr.bf16.mxu1 %v1430_v50 }
  0x3c   : > { %1282 = vmatpush3.bf16.msra.mxu0 %v1427_v48 }
  0x3d   : > { %1326 = vmatpush3.bf16.msra.mxu1 %v1427_v48  ;;  %1283 = vmatprep.subr.bf16.mxu0 %v1434_v52 }
  0x3e   : > { %1319 = vmatprep.subr.bf16.mxu1 %v1434_v52 }
  0x3f   : > { %809 = vmatmul.mubr.bf16.gmra.mrb[8].mxu0 %v1432_v51 }
  0x40   : > { %874 = vmatmul.mubr.bf16.gmra.mrb[8].mxu1 %v1433_v53  ;;  %1284 = vmatpush3.bf16.msra.mxu0 %v1435_v54 }
  0x41   : > { %816 = vmatprep.mubr.bf16.mxu0 %v1438_v56  ;;  %1327 = vmatpush3.bf16.msra.mxu1 %v1435_v54 }
  0x42   : > { %1285 = vmatprep.subr.bf16.mxu0 %v1436_v55  ;;  %1320 = vmatprep.subr.bf16.mxu1 %v1436_v55 }
  0x43   : > { %881 = vmatprep.mubr.bf16.mxu1 %v1440_v57 }
  0x44   : > { %1286 = vmatpush3.bf16.msra.mxu0 %v1437_v58 }
  0x45   : > { %1328 = vmatpush3.bf16.msra.mxu1 %v1437_v58  ;;  %1287 = vmatprep.subr.bf16.mxu0 %v1444_v59 }
  0x46   : > { %1321 = vmatprep.subr.bf16.mxu1 %v1444_v59 }
  0x47   : > { %817 = vmatmul.mubr.bf16.gmra.mrb[12].mxu0 %v1442_v60 }
  0x48   : > { %882 = vmatmul.mubr.bf16.gmra.mrb[12].mxu1 %v1443_v61  ;;  %922 = vmatprep.mubr.bf16.mxu0 %v1450_v0 }
  0x49   : > { %1288 = vmatpush3.bf16.msra.mxu0 %v1445_v62  ;;  %1329 = vmatpush3.bf16.msra.mxu1 %v1445_v62 }
  0x4a   : > { %1289 = vmatprep.subr.bf16.mxu0 %v1446_v63  ;;  %1322 = vmatprep.subr.bf16.mxu1 %v1446_v63 }
  0x4b   : > { %938 = vmatprep.mubr.bf16.mxu1 %v1453_v1 }
  0x4d   : > { %1290 = vmatpush3.bf16.msra.mxu0 %v1447_v2  ;;  %1330 = vmatpush3.bf16.msra.mxu1 %v1447_v2 }
  0x50   : > { %923 = vmatmul.mubr.bf16.vlgmr.msra.gmra.mrb[16].mxu0 %v1448_v5  ;;  %939 = vmatmul.mubr.bf16.vlgmr.msra.gmra.mrb[16].mxu1 %v1451_v6 }
  0x51   : > { %930 = vmatprep.mubr.bf16.mxu0 %v1454_v7  ;;  %946 = vmatprep.mubr.bf16.mxu1 %v1456_v9 }
  0x58   : > { %931 = vmatmul.mubr.bf16.gmra.mrb[20].mxu0 %v1458_v13  ;;  %947 = vmatmul.mubr.bf16.gmra.mrb[20].mxu1 %v1459_v14 }
  0xa1   : > { %v966_v3 = vpop.permute.xlu0 %965 }
  0xa5   : > { %v1811_v1 = vpop.permute.xlu1 %975 }
 0x102   : > { %v1211_v17 = vpop.f32.mrb[0].mxu0 }
 0x103   : > { %v1251_v18 = vpop.f32.mrb[0].mxu1  ;;  %v1212_v20 = vpop.f32.mrb[1].mxu0 }
 0x104   : > { %v1213_v21 = vadd.f32 %v1212_v20, %v1211_v17  ;;  %v1252_v22 = vpop.f32.mrb[1].mxu1  ;;  %v1214_v23 = vpop.f32.mrb[2].mxu0 }
 0x105   : > { %v1253_v24 = vadd.f32 %v1252_v22, %v1251_v18  ;;  %v1254_v25 = vpop.f32.mrb[2].mxu1  ;;  %v1215_v26 = vpop.f32.mrb[3].mxu0 }
 0x106   : > { %v795_v27 = vadd.f32 %v1213_v21, %v1795_v19  ;;  %v1216_v28 = vadd.f32 %v1215_v26, %v1214_v23  ;;  %v1255_v29 = vpop.f32.mrb[3].mxu1  ;;  %v981_v21 = vpop.permute.xlu1 %980 }
 0x107   : > { %v1256_v30 = vadd.f32 %v1255_v29, %v1254_v25  ;;  %v971_v22 = vpop.permute.xlu0 %970 }
 0x108   : > { %v1798_v31 = vadd.f32 %v1253_v24, %v795_v27  ;;  %v798_v32 = vadd.f32 %v1216_v28, %v1795_v19 }
 0x10a   : > { %v1801_v33 = vadd.f32 %v1256_v30, %v798_v32  ;;  %v1217_v34 = vpop.f32.mrb[4].mxu0 }
 0x10b   : > { %v1257_v35 = vpop.f32.mrb[4].mxu1  ;;  %v1218_v36 = vpop.f32.mrb[5].mxu0 }
 0x10c   : > { %v1219_v37 = vadd.f32 %v1218_v36, %v1217_v34  ;;  %v1258_v38 = vpop.f32.mrb[5].mxu1  ;;  %v1220_v39 = vpop.f32.mrb[6].mxu0 }
 0x10d   : > { %v1259_v40 = vadd.f32 %v1258_v38, %v1257_v35  ;;  %v1260_v41 = vpop.f32.mrb[6].mxu1  ;;  %v1221_v42 = vpop.f32.mrb[7].mxu0 }
 0x10e   : > { %v803_v43 = vadd.f32 %v1219_v37, %v1795_v19  ;;  %v1222_v44 = vadd.f32 %v1221_v42, %v1220_v39  ;;  %v1261_v45 = vpop.f32.mrb[7].mxu1  ;;  %v986_v38 = vpop.permute.xlu0 %985 }
 0x10f   : > { %v1262_v46 = vadd.f32 %v1261_v45, %v1260_v41 }
 0x110   : > { %v1804_v47 = vadd.f32 %v1259_v40, %v803_v43  ;;  %v806_v48 = vadd.f32 %v1222_v44, %v1795_v19  ;;  %v991_v43 = vpop.permute.xlu1 %990 }
 0x112   : > { %v1807_v49 = vadd.f32 %v1262_v46, %v806_v48  ;;  %v1223_v50 = vpop.f32.mrb[8].mxu0 }
 0x113   : > { %v1263_v51 = vpop.f32.mrb[8].mxu1  ;;  %v1224_v52 = vpop.f32.mrb[9].mxu0 }
 0x114   : > { %v1225_v53 = vadd.f32 %v1224_v52, %v1223_v50  ;;  %v1264_v54 = vpop.f32.mrb[9].mxu1  ;;  %v1226_v55 = vpop.f32.mrb[10].mxu0 }
 0x115   : > { %v1265_v56 = vadd.f32 %v1264_v54, %v1263_v51  ;;  %v1266_v57 = vpop.f32.mrb[10].mxu1  ;;  %v1227_v58 = vpop.f32.mrb[11].mxu0 }
 0x116   : > { %v811_v59 = vadd.f32 %v1225_v53, %v1795_v19  ;;  %v1228_v60 = vadd.f32 %v1227_v58, %v1226_v55  ;;  %v1267_v61 = vpop.f32.mrb[11].mxu1 }
 0x117   : > { %v1268_v62 = vadd.f32 %v1267_v61, %v1266_v57 }
 0x118   : > { %v876_v63 = vadd.f32 %v1265_v56, %v811_v59  ;;  %v814_v0 = vadd.f32 %v1228_v60, %v1795_v19  ;;  %v996_v60 = vpop.permute.xlu0 %995 }
 0x11a   : > { %v879_v2 = vadd.f32 %v1268_v62, %v814_v0  ;;  %v1229_v4 = vpop.f32.mrb[12].mxu0 }
 0x11b   : > { %v1269_v5 = vpop.f32.mrb[12].mxu1  ;;  %v1230_v6 = vpop.f32.mrb[13].mxu0 }
 0x11c   : > { %v1231_v7 = vadd.f32 %v1230_v6, %v1229_v4  ;;  %v1270_v8 = vpop.f32.mrb[13].mxu1  ;;  %v1232_v9 = vpop.f32.mrb[14].mxu0 }
 0x11d   : > { %v1271_v10 = vadd.f32 %v1270_v8, %v1269_v5  ;;  %v1272_v11 = vpop.f32.mrb[14].mxu1  ;;  %v1233_v12 = vpop.f32.mrb[15].mxu0 }
 0x11e   : > { %v819_v13 = vadd.f32 %v1231_v7, %v1795_v19  ;;  %v1234_v14 = vadd.f32 %v1233_v12, %v1232_v9  ;;  %v1273_v15 = vpop.f32.mrb[15].mxu1 }
 0x11f   : > { %v1274_v16 = vadd.f32 %v1273_v15, %v1272_v11 }
 0x120   : > { %v884_v17 = vadd.f32 %v1271_v10, %v819_v13  ;;  %v822_v18 = vadd.f32 %v1234_v14, %v1795_v19 }
 0x122   : > { %v887_v20 = vadd.f32 %v1274_v16, %v822_v18 }
 0x123   : > { %v1291_v23 = vpop.f32.mrb[16].mxu0  ;;  %v1303_v24 = vpop.f32.mrb[16].mxu1 }
 0x124   : > { %v1292_v25 = vpop.f32.mrb[17].mxu0  ;;  %v1304_v27 = vpop.f32.mrb[17].mxu1 }
 0x125   : > { %v1293_v26 = vadd.f32 %v1292_v25, %v1291_v23  ;;  %v1294_v28 = vpop.f32.mrb[18].mxu0  ;;  %v1305_v29 = vadd.f32 %v1304_v27, %v1303_v24  ;;  %v1306_v30 = vpop.f32.mrb[18].mxu1 }
 0x126   : > { %v1295_v32 = vpop.f32.mrb[19].mxu0  ;;  %v1307_v36 = vpop.f32.mrb[19].mxu1 }
 0x127   : > { %v925_v34 = vadd.f32 %v1293_v26, %v1798_v31  ;;  %v1296_v35 = vadd.f32 %v1295_v32, %v1294_v28  ;;  %v941_v19 = vadd.f32 %v1305_v29, %v876_v63  ;;  %v1308_v37 = vadd.f32 %v1307_v36, %v1306_v30 }
 0x129   : > { %v1003_v39 = vmul.f32 %v966_v3, %v925_v34  ;;  %v928_v40 = vadd.f32 %v1296_v35, %v1801_v33  ;;  %v1007_v41 = vmul.f32 %v986_v38, %v941_v19  ;;  %v944_v42 = vadd.f32 %v1308_v37, %v879_v2  ;;  %v1001_v2 = vpop.permute.xlu1 %1000 }
 0x12b   : > { %1011 = vst [vmem:[%s1820_s12] sm:$0xff] %v1003_v39  ;;  %v1004_v44 = vmul.f32 %v971_v22, %v928_v40  ;;  %v1297_v31 = vpop.f32.mrb[20].mxu0  ;;  %1015 = vst [vmem:[%s1820_s12 + $0x20] sm:$0xff] %v1007_v41  ;;  %v1008_v45 = vmul.f32 %v991_v43, %v944_v42  ;;  %v1309_v46 = vpop.f32.mrb[20].mxu1 }
 0x12c   : > { %v1298_v48 = vpop.f32.mrb[21].mxu0  ;;  %v1310_v50 = vpop.f32.mrb[21].mxu1 }
 0x12d   : > { %1012 = vst [vmem:[%s1820_s12 + $0x8] sm:$0xff] %v1004_v44  ;;  %v1299_v33 = vadd.f32 %v1298_v48, %v1297_v31  ;;  %v1300_v51 = vpop.f32.mrb[22].mxu0  ;;  %1016 = vst [vmem:[%s1820_s12 + $0x28] sm:$0xff] %v1008_v45  ;;  %v1311_v52 = vadd.f32 %v1310_v50, %v1309_v46  ;;  %v1312_v53 = vpop.f32.mrb[22].mxu1 }
 0x12e   : > { %v1301_v54 = vpop.f32.mrb[23].mxu0  ;;  %v1313_v57 = vpop.f32.mrb[23].mxu1 }
 0x12f   : > { %v933_v55 = vadd.f32 %v1299_v33, %v1804_v47  ;;  %v1302_v56 = vadd.f32 %v1301_v54, %v1300_v51  ;;  %v949_v58 = vadd.f32 %v1311_v52, %v884_v17  ;;  %v1314_v59 = vadd.f32 %v1313_v57, %v1312_v53 }
 0x131   : > { %v1005_v61 = vmul.f32 %v1811_v1, %v933_v55  ;;  %v936_v62 = vadd.f32 %v1302_v56, %v1807_v49  ;;  %v1009_v63 = vmul.f32 %v996_v60, %v949_v58  ;;  %v952_v0 = vadd.f32 %v1314_v59, %v887_v20 }
 0x133   : > { %1013 = vst [vmem:[%s1820_s12 + $0x10] sm:$0xff] %v1005_v61  ;;  %v1006_v47 = vmul.f32 %v981_v21, %v936_v62  ;;  %1017 = vst [vmem:[%s1820_s12 + $0x30] sm:$0xff] %v1009_v63  ;;  %v1010_v1 = vmul.f32 %v1001_v2, %v952_v0 }
 0x135   : > { %1014 = vst [vmem:[%s1820_s12 + $0x18] sm:$0xff] %v1006_v47  ;;  %1018 = vst [vmem:[%s1820_s12 + $0x38] sm:$0xff] %v1010_v1 }
 0x136   : > { %1473 = shalt.err (!%p1470_p3)
}
 0x137   : > { %s1474_s7 = scalar_lea.hbm %s1835_s28, 1024  ;;  %s1478_s9 = scalar_lea.hbm %s1889_s4, 2048 }
 0x138   : > { %p1475_p4 = scmp.ne.s32.totalorder %s1835_s28, %s1474_s7  ;;  %p1479_p9 = scmp.lt.u32.totalorder %s1835_s28, %s1889_s4 }
 0x139   : > { %p1480_p10 = scmp.lt.u32.totalorder %s1478_s9, %s1474_s7  ;;  %p1482_p12 = scmp.lt.u32.totalorder %s1474_s7, %s1835_s28 }
 0x13a   : > { %p1476_p7 = pnand %p1475_p4, %p1591_p5 }
 0x13b   : > { %p1481_p11 = por %p1480_p10, %p1479_p9 }
 0x13c   : > { %p1477_p8 = pneg %p1476_p7 }
 0x13d   : > { %p1483_p13 = por %p1482_p12, %p1481_p11 }
 0x13f   : > { %p1484_p0 = pnand %p1483_p13, %p1477_p8 }
 0x141   : > { %1487 = shalt.err (!%p1484_p0)
}
 0x142   : > { %s1526_s11 = smov 128   ;;  %s1527_s12 = smov 8  }
 0x143   : > { %1332 = dma.vmem_to_hbm [thread:$0]  (%p1591_p5), %s1837_s20, 1024, %s1835_s28, %s1844_s19, %s1526_s11, %s1526_s11, %s1527_s12  }
 0x144 PF: > { %p1338_p1 = scmp.ge.s32.totalorder %s1522_s18, 2  ;;  %s1048_s13 = sand.u32 1, %s1510_s15  }
 0x145   : > { %s1049_s23 = scalar_lea.sflag [#allocation3], %s1048_s13 }
 0x146   : > { %p1335_p2 = pnand %p1338_p1, %p1595_p6 }
 0x148   : > { %1505 = dma.done.wait (!%p1335_p2), %s1049_s23, 1024  }
 0x149   : > { %1507 = vsyncadd (!%p1335_p2), %s1049_s23, 4294966272  ;;  %p14_p3 = scmp.ge.s32.totalorder %s1578_s21, 4   ;;  %s1892_s15 = smov %s1514_s16 }
 0x14a   : > { %s1893_s16 = smov %s1518_s17  ;;  %s1894_s17 = smov %s1589_s24 }
 0x14b   : > { %s1895_s18 = smov %s1578_s21  ;;  %16 = sbr.rel (!%p14_p3) target bundleno = 3 (0x3), region = 74 }
 0x152   :  { %1054 = vsyncpa [#allocation3], 1 }
 0x153   :  { %1056 = vsyncpa [#allocation3 + $0x1], 1 }

</bundles_post_ra>
